<compile_context>
chip_gen: v7x
topology: tpu7x:2x2x1
jax: 0.10.0
libtpu: 0.0.40
codegen_flags: <defaults>
</compile_context>

<pallas_src>
import jax
import jax.numpy as jnp
from jax.experimental import pallas as pl
from jax.experimental.pallas import tpu as pltpu

_LANE = 128
_SUB = 8


def _rup(v, m):
    return -(-v // m) * m


def _conv1x1_kernel(x_ref, w_ref, b_ref, o_ref, acc_ref):
    # x_ref: (1, tCin, tHW)  w_ref: (tCout, tCin)  b_ref: (tCout, 1)
    # o_ref: (1, tCout, tHW) acc_ref: (tCout, tHW) f32 scratch
    k = pl.program_id(3)

    @pl.when(k == 0)
    def _():
        acc_ref[...] = jnp.zeros_like(acc_ref)

    acc_ref[...] += jnp.dot(w_ref[...], x_ref[0],
                            preferred_element_type=jnp.float32)

    @pl.when(k == pl.num_programs(3) - 1)
    def _():
        o_ref[0] = (acc_ref[...] + b_ref[...]).astype(o_ref.dtype)


@jax.jit
def conv1x1(x_nchw, weight, bias):
    """1x1 conv, semantics identical to nn.Conv2d(inCh, outCh, kernel_size=1).

    x_nchw : (N, Cin, H, W) float32
    weight : (Cout, Cin, 1, 1) float32   (PyTorch conv weight layout)
    bias   : (Cout,) float32
    returns: (N, Cout, H, W) float32
    """
    N, Cin, H, W = x_nchw.shape
    Cout = weight.shape[0]
    HW = H * W
    f32 = 4

    # Free reshapes (no data movement): NCHW -> (N, Cin, HW), weight -> (Cout, Cin).
    x3 = x_nchw.reshape(N, Cin, HW)
    w_mat = weight.reshape(Cout, Cin)
    b_col = bias.reshape(Cout, 1)

    # ---- Channel tiling -----------------------------------------------------
    # Cout tile: parallel axis; keeps the weight block bounded for big models.
    t_cout = Cout if Cout <= 256 else 256
    n_cout = pl.cdiv(Cout, t_cout)          # ragged Cout edge is masked (safe)
    # Cin tile: reduction axis. Only tile when it divides evenly — garbage lanes
    # in a ragged K block would corrupt valid outputs, so otherwise keep full Cin.
    t_cin = 256 if (Cin > 512 and Cin % 256 == 0) else Cin
    n_cin = pl.cdiv(Cin, t_cin)

    # ---- Spatial (HW) tiling ------------------------------------------------
    # Target ~2 MiB per activation / output block (past the HBM-roofline knee,
    # small enough that double-buffering gives real overlap on all generations).
    target_blk = 2 * 1024 * 1024
    thw_cap = min(target_blk // (_rup(t_cin, _SUB) * f32),
                  target_blk // (_rup(t_cout, _SUB) * f32))
    thw_cap = max(_LANE, (thw_cap // _LANE) * _LANE)

    if HW <= _LANE:
        thw = HW                              # full-dim block (always legal)
    else:
        # v7x has 2 TensorCores fed by sharding parallel grid axes: make sure
        # we expose at least ~4 parallel grid points even for tiny N.
        n_par = N * n_cout
        min_hw_tiles = 1 if n_par >= 4 else max(2, -(-4 // max(n_par, 1)))
        thw = min(thw_cap, _rup(-(-HW // min_hw_tiles), _LANE))
        thw = max(thw, _LANE)
        if thw >= HW:
            thw = HW                          # single full-dim block
    n_hw = pl.cdiv(HW, thw)                   # ragged last HW tile is masked

    grid = (N, n_cout, n_hw, n_cin)

    # ---- VMEM accounting & explicit limit ------------------------------------
    # Real block sizes after sublane (8) / lane (128) rounding, x2 for the
    # default double buffering of every pipelined operand, + f32 accumulator.
    x_blk = _rup(t_cin, _SUB) * _rup(thw, _LANE) * f32
    o_blk = _rup(t_cout, _SUB) * _rup(thw, _LANE) * f32
    w_blk = _rup(t_cout, _SUB) * _rup(t_cin, _LANE) * f32
    b_blk = _rup(t_cout, _SUB) * _LANE * f32
    acc_blk = _rup(t_cout, _SUB) * _rup(thw, _LANE) * f32
    vmem_est = 2 * (x_blk + o_blk + w_blk + b_blk) + acc_blk
    # v5e default scoped VMEM is only 16 MiB -> always set the limit explicitly.
    # Cap at 48 MiB so we stay inside v7x's 64 MiB physical VMEM.
    vmem_limit = min(max(int(vmem_est * 1.5) + (4 << 20), 32 << 20), 48 << 20)

    out3 = pl.pallas_call(
        _conv1x1_kernel,
        out_shape=jax.ShapeDtypeStruct((N, Cout, HW), x_nchw.dtype),
        grid_spec=pltpu.PrefetchScalarGridSpec(
            num_scalar_prefetch=0,
            grid=grid,
            in_specs=[
                pl.BlockSpec((1, t_cin, thw), lambda n, co, j, k: (n, k, j)),
                pl.BlockSpec((t_cout, t_cin), lambda n, co, j, k: (co, k)),
                pl.BlockSpec((t_cout, 1), lambda n, co, j, k: (co, 0)),
            ],
            out_specs=pl.BlockSpec((1, t_cout, thw),
                                   lambda n, co, j, k: (n, co, j)),
            scratch_shapes=[pltpu.VMEM((t_cout, thw), jnp.float32)],
        ),
        compiler_params=pltpu.CompilerParams(
            dimension_semantics=("parallel", "parallel", "parallel", "arbitrary"),
            vmem_limit_bytes=vmem_limit,
        ),
    )(x3, w_mat, b_col)

    return out3.reshape(N, Cout, H, W)


if __name__ == "__main__":
    # Small shapes consistent with the module: batch=2, inCh=4, outCh=8, spatial=16.
    N, Cin, Cout, Hs, Ws = 2, 4, 8, 16, 16

    key = jax.random.PRNGKey(0)
    kx, kw, kb = jax.random.split(key, 3)

    x = jax.random.normal(kx, (N, Cin, Hs, Ws), dtype=jnp.float32)
    # Deterministic parameter init (shapes match nn.Conv2d(inCh, outCh, 1)).
    bound = 1.0 / (Cin ** 0.5)
    weight = jax.random.uniform(kw, (Cout, Cin, 1, 1), jnp.float32, -bound, bound)
    bias = jax.random.uniform(kb, (Cout,), jnp.float32, -bound, bound)

    y = conv1x1(x, weight, bias)
    jax.block_until_ready(y)

    # Sanity check against a plain-JAX reference of the same conv.
    ref = (jnp.einsum("nchw,oc->nohw", x, weight.reshape(Cout, Cin))
           + bias.reshape(1, Cout, 1, 1))
    assert y.shape == (N, Cout, Hs, Ws)
    assert jnp.allclose(y, ref, atol=1e-5, rtol=1e-5)

    print("KERNEL_OK")
</pallas_src>

<mosaic_0001>
module attributes {stable_mosaic.version = 11 : i64} {
  func.func @_conv1x1_kernel(%arg0: i32, %arg1: i32, %arg2: i32, %arg3: i32, %arg4: memref<1x4x128xf32, #tpu.memory_space<vmem>>, %arg5: memref<8x4xf32, #tpu.memory_space<vmem>>, %arg6: memref<8x1xf32, #tpu.memory_space<vmem>>, %arg7: memref<1x8x128xf32, #tpu.memory_space<vmem>>, %arg8: memref<8x128xf32, #tpu.memory_space<vmem>>) attributes {dimension_semantics = [#tpu.dimension_semantics<parallel>, #tpu.dimension_semantics<parallel>, #tpu.dimension_semantics<parallel>, #tpu.dimension_semantics<arbitrary>], iteration_bounds = array<i64: 2, 1, 2, 1>, scalar_prefetch = 0 : i64, scratch_operands = 1 : i64, tpu.core_type = #tpu.core_type<tc>, window_params = [{transform_indices = @transform_0, window_bounds = array<i64: 1, 4, 128>}, {transform_indices = @transform_1, window_bounds = array<i64: 8, 4>}, {transform_indices = @transform_2, window_bounds = array<i64: 8, 1>}, {transform_indices = @transform_3, window_bounds = array<i64: 1, 8, 128>}]} {
    %c0_i32 = arith.constant 0 : i32
    %0 = arith.cmpi eq, %arg3, %c0_i32 : i32
    %1 = arith.extui %0 : i1 to i32
    %c0_i32_0 = arith.constant 0 : i32
    %2 = arith.cmpi ne, %1, %c0_i32_0 : i32
    scf.if %2 {
      %cst_11 = arith.constant 0.000000e+00 : f32
      %13 = vector.broadcast %cst_11 : f32 to vector<8x128xf32>
      %c0_12 = arith.constant 0 : index
      %c0_13 = arith.constant 0 : index
      %14 = vector.load %arg8[%c0_12, %c0_13] : memref<8x128xf32, #tpu.memory_space<vmem>>, vector<8x128xf32>
      tpu.vector_store %arg8[%c0_12, %c0_13], %13 {strides = array<i32>} : memref<8x128xf32, #tpu.memory_space<vmem>>, vector<8x128xf32>,
    } else {
    }
    %c0 = arith.constant 0 : index
    %c0_1 = arith.constant 0 : index
    %3 = vector.load %arg8[%c0, %c0_1] : memref<8x128xf32, #tpu.memory_space<vmem>>, vector<8x128xf32>
    %c0_2 = arith.constant 0 : index
    %c0_3 = arith.constant 0 : index
    %4 = vector.load %arg5[%c0_2, %c0_3] : memref<8x4xf32, #tpu.memory_space<vmem>>, vector<8x4xf32>
    %c0_4 = arith.constant 0 : index
    %c0_5 = arith.constant 0 : index
    %c0_6 = arith.constant 0 : index
    %5 = vector.load %arg4[%c0_4, %c0_5, %c0_6] : memref<1x4x128xf32, #tpu.memory_space<vmem>>, vector<1x4x128xf32>
    %6 = vector.shape_cast %5 : vector<1x4x128xf32> to vector<4x128xf32>
    %cst = arith.constant dense<0.000000e+00> : vector<8x128xf32>
    %7 = tpu.matmul %4, %6, %cst {dimension_numbers = #tpu.dot_dimension_numbers<[1], [0], [0], [1], [0, 0, 1, 1], [], []>} : vector<8x4xf32>, vector<4x128xf32>, vector<8x128xf32> -> vector<8x128xf32>
    %8 = arith.addf %3, %7 : vector<8x128xf32>
    %c0_7 = arith.constant 0 : index
    %c0_8 = arith.constant 0 : index
    %9 = vector.load %arg8[%c0_7, %c0_8] : memref<8x128xf32, #tpu.memory_space<vmem>>, vector<8x128xf32>
    tpu.vector_store %arg8[%c0_7, %c0_8], %8 {strides = array<i32>} : memref<8x128xf32, #tpu.memory_space<vmem>>, vector<8x128xf32>,
    %c0_i32_9 = arith.constant 0 : i32
    %10 = arith.cmpi eq, %arg3, %c0_i32_9 : i32
    %11 = arith.extui %10 : i1 to i32
    %c0_i32_10 = arith.constant 0 : i32
    %12 = arith.cmpi ne, %11, %c0_i32_10 : i32
    scf.if %12 {
      %c0_11 = arith.constant 0 : index
      %c0_12 = arith.constant 0 : index
      %13 = vector.load %arg8[%c0_11, %c0_12] : memref<8x128xf32, #tpu.memory_space<vmem>>, vector<8x128xf32>
      %c0_13 = arith.constant 0 : index
      %c0_14 = arith.constant 0 : index
      %14 = vector.load %arg6[%c0_13, %c0_14] : memref<8x1xf32, #tpu.memory_space<vmem>>, vector<8x1xf32>
      %15 = vector.broadcast %14 : vector<8x1xf32> to vector<8x128xf32>
      %16 = arith.addf %13, %15 : vector<8x128xf32>
      %c0_15 = arith.constant 0 : index
      %c0_16 = arith.constant 0 : index
      %c0_17 = arith.constant 0 : index
      %17 = vector.load %arg7[%c0_15, %c0_16, %c0_17] : memref<1x8x128xf32, #tpu.memory_space<vmem>>, vector<1x8x128xf32>
      %18 = vector.shape_cast %17 : vector<1x8x128xf32> to vector<8x128xf32>
      %19 = vector.shape_cast %16 : vector<8x128xf32> to vector<1x8x128xf32>
      tpu.vector_store %arg7[%c0_15, %c0_16, %c0_17], %19 {strides = array<i32>} : memref<1x8x128xf32, #tpu.memory_space<vmem>>, vector<1x8x128xf32>,
    } else {
    }
    return
  }
  func.func @transform_0(%arg0: i32, %arg1: i32, %arg2: i32, %arg3: i32) -> (i32, i32, i32) {
    %c0_i32 = arith.constant 0 : i32
    return %arg0, %arg3, %arg2 : i32, i32, i32
  }
  func.func @transform_1(%arg0: i32, %arg1: i32, %arg2: i32, %arg3: i32) -> (i32, i32) {
    %c0_i32 = arith.constant 0 : i32
    return %arg1, %arg3 : i32, i32
  }
  func.func @transform_2(%arg0: i32, %arg1: i32, %arg2: i32, %arg3: i32) -> (i32, i32) {
    %c0_i32 = arith.constant 0 : i32
    %c0_i32_0 = arith.constant 0 : i32
    return %arg1, %c0_i32 : i32, i32
  }
  func.func @transform_3(%arg0: i32, %arg1: i32, %arg2: i32, %arg3: i32) -> (i32, i32, i32) {
    %c0_i32 = arith.constant 0 : i32
    return %arg0, %arg1, %arg2 : i32, i32, i32
  }
}

</mosaic_0001>

<bundles_post_ra>
// kernel: conv1x1.1
= control target key start
LH: loop header
LB: loop body
LE: loop exit
PB: predicated region body
PF: predicated region fallthrough
CT: control target
= control target key end

     0   :  { %s662_s12 = smov 0   ;;  %s664_s13 = smov 0   ;;  %s719_s0 = inlined_call_operand.vmem [shape: f32[2,4,256], index: 0, kind: input, shape index: {}]   ;;  %s720_s1 = inlined_call_operand.vmem [shape: f32[8,4], index: 1, kind: input, shape index: {}]   ;;  %s721_s2 = inlined_call_operand.vmem [shape: f32[8,1], index: 2, kind: input, shape index: {}]   ;;  %s722_s3 = inlined_call_operand.vmem [shape: f32[2,8,256], index: 3, kind: output, shape index: {}]  }
   0x1   :  { %s666_s14 = smov 0   ;;  %s668_s15 = smov 0  }
   0x2   :  { %s670_s16 = smov 0  }
   0x3 LB: > { %s31_s17 = sadd.s32 1, %s629_s14  ;;  %s39_s18 = sadd.s32 1, %s633_s15  ;;  %s637_s16 = sphi %s670_s16, %s13_s16   ;;  %s633_s15 = sphi %s668_s15, %s726_s15   ;;  %s629_s14 = sphi %s666_s14, %s725_s14   ;;  %s625_s13 = sphi %s664_s13, %s724_s13   ;;  %s621_s12 = sphi %s662_s12, %s723_s12  }
   0x4   : > { %p33_p0 = scmp.ge.s32.totalorder %s31_s17, 2  ;;  %p539_p1 = scmp.ge.s32.totalorder %s637_s16, 1 }
   0x5   : > { %p201_p2 = scmp.lt.s32.totalorder %s637_s16, 5 }
   0x6   : > { %s728_s17 = smov (%p33_p0, %s31_s17), 0  ;;  %s730_s18 = smov (!%p33_p0, %s39_s18), %s633_s15 }
   0x7   : > { %p202_p3 = pnand %p539_p1, %p201_p2  ;;  %p41_p4 = scmp.ge.s32.totalorder %s730_s18, 2 }
   0x8   : > { %p250_p5 = scmp.lt.s32.totalorder (!%p202_p3), %s625_s13, 1  ;;  %p254_p6 = scmp.lt.s32.totalorder (!%p202_p3), %s621_s12, 1  ;;  %v639_v0 = vmov (!%p202_p3), 0.0   ;;  %vm640_vm0 = vmmov (!%p202_p3), 0   ;;  %v377_v1 = vld [vmem:[%s721_s2] sm:$0xff] (!%p202_p3)  ;;  %v641_v2 = vmov (!%p202_p3), 0  }
   0x9   : > { %s732_s18 = smov (%p41_p4, %s730_s18), 0  ;;  %205 = sbr.rel (%p202_p3) target bundleno = 238 (0xee), region = 32 }
   0xa   : > { %550 = vmatprep.subr.mxu0 (!%p202_p3), %v639_v0  ;;  %552 = vmatprep.mubr.msk.f32.mxu0 (!%p202_p3), %vm640_vm0, %v639_v0  ;;  %vm297_vm1 = vcmask (!%p202_p3), 1043456   ;;  %v291_v3 = vld [vmem:[%s720_s1] sm:$0xff] (!%p202_p3)  ;;  %vm293_vm2 = vcmask (!%p202_p3), 31744  }
   0xb   : > { %598 = vset.pattern.permute.xlu0 (!%p202_p3), %v641_v2 }
   0xc   : > { %380 = vperm.xlu0 (!%p202_p3), %598, %v377_v1  }
  0x10   : > { %s734_s13 = smov (!%p250_p5, %s625_s13), 1  ;;  %s736_s12 = smov (!%p254_p6, %s621_s12), 1 }
  0x11   : > { %s540_s21 = sshll.u32 %s734_s13, 1 }
  0x12   : > { %s259_s22 = sadd.s32 %s540_s21, %s736_s12 }
  0x13   : > { %s541_s23 = sshll.u32 %s259_s22, 2  ;;  %s543_s29 = sshll.u32 %s259_s22, 3 }
  0x14   : > { %s261_s26 = scalar_lea.vmem %s719_s0, %s541_s23  ;;  %s284_s5 = scalar_lea.vmem %s722_s3, %s543_s29 }
  0x15   : > { %v292_v4 = vld [vmem:[%s261_s26] sm:$0xf] }
  0x16   : > { %551 = vmatpush3.msk.msra.mxu0 %vm297_vm1, %v292_v4 }
  0x17   : > { %553 = vmatmul.mubr.msk.f32.vlgmr.msra.gmra.mrb[0].mxu0 %vm293_vm2, %v291_v3 }
  0x8b   : > { %v381_v5 = vpop.permute.xlu0 %380 }
  0xea   : > { %v367_v6 = vpop.f32.mrb[0].mxu0 }
  0xeb   : > { %v383_v7 = vadd.f32 %v381_v5, %v367_v6  ;;  %v554_v8 = vpop.f32.mrb[1].mxu0 }
  0xed   : > { %384 = vst [vmem:[%s284_s5] sm:$0xff] %v383_v7 }
  0xee PF: > { %s13_s16 = sadd.s32 1, %s637_s16   ;;  %s723_s12 = smov %s629_s14 }
  0xef   : > { %p10_p7 = scmp.ge.s32.totalorder %s13_s16, 6   ;;  %s724_s13 = smov %s633_s15 }
  0xf0   : > { %s725_s14 = smov %s728_s17  ;;  %s726_s15 = smov %s732_s18 }
  0xf1   :  { %12 = sbr.rel (!%p10_p7) target bundleno = 3 (0x3), region = 76 }

</bundles_post_ra>
